<compile_context>
chip_gen: v7x
topology: tpu7x:2x2x1
jax: 0.10.0
libtpu: 0.0.40
codegen_flags: <defaults>
</compile_context>

<pallas_src>
import functools

import jax
import jax.numpy as jnp
from jax import lax
from jax.experimental import pallas as pl
from jax.experimental.pallas import tpu as pltpu


def _round_up(x, m):
    return ((x + m - 1) // m) * m


def _attentive_pool_kernel(
    x_ref,        # (1, TT, E)   input tile (one batch element, one T tile), native dtype
    w1t_ref,      # (E, R)       fc1 weight, pre-transposed, native dtype
    b1_ref,       # (1, R)       fc1 bias, f32
    w2r_ref,      # (1, R)       fc2 weight, channel 0 only, f32
    b2_ref,       # (1, 1)       fc2 bias, channel 0 only, f32
    o_ref,        # (1, A, E)    output block (all A chunks identical, as in the module)
    m_sc,         # (1, 1) f32   running max      (online softmax)
    l_sc,         # (1, 1) f32   running denom
    acc_sc,       # (1, E) f32   running weighted sum of x
    *,
    t_actual,
    t_tile,
    needs_mask,
):
    k = pl.program_id(1)
    k_last = pl.num_programs(1) - 1

    @pl.when(k == 0)
    def _():
        m_sc[...] = jnp.full_like(m_sc, -jnp.inf)
        l_sc[...] = jnp.zeros_like(l_sc)
        acc_sc[...] = jnp.zeros_like(acc_sc)

    xn = x_ref[0]                                 # (TT, E) native dtype for the MXU
    xb32 = xn.astype(jnp.float32)                 # (TT, E) f32 for the accumulation path

    # fc1 -> tanh (MXU matmul, f32 accumulation; tanh goes to the EUP).
    h = jnp.tanh(
        jnp.dot(xn, w1t_ref[...], precision=lax.Precision.HIGHEST,
                preferred_element_type=jnp.float32) + b1_ref[...])   # (TT, R)

    # fc2, channel 0 only: lane-reduce instead of a 1-wide matmul.
    logit = jnp.sum(h * w2r_ref[...], axis=-1, keepdims=True) + b2_ref[...]  # (TT, 1)

    # Mask rows that are zero-padding of T (only emitted if padding exists).
    if needs_mask:
        rows = k * t_tile + lax.broadcasted_iota(jnp.int32, logit.shape, 0)
        logit = jnp.where(rows < t_actual, logit, -jnp.inf)

    # Online softmax accumulation over the streamed T axis.
    m_prev = m_sc[...]
    m_tile = jnp.max(logit, axis=0, keepdims=True)          # (1, 1)
    m_new = jnp.maximum(m_prev, m_tile)
    alpha = jnp.exp(m_prev - m_new)                         # (1, 1)
    p = jnp.exp(logit - m_new)                              # (TT, 1)

    l_sc[...] = alpha * l_sc[...] + jnp.sum(p, axis=0, keepdims=True)
    acc_sc[...] = alpha * acc_sc[...] + jnp.sum(p * xb32, axis=0, keepdims=True)
    m_sc[...] = m_new

    @pl.when(k == k_last)
    def _():
        inv_l = pl.reciprocal(l_sc[...], approx=False)               # (1, 1)
        pooled = acc_sc[...] * inv_l * jnp.float32(1.0 / t_actual)   # (1, E)
        a = o_ref.shape[1]
        e = o_ref.shape[2]
        # The original module concatenates the SAME channel-0 pooling A times;
        # emit it as a broadcast store (no in-kernel concatenate).
        o_ref[...] = jnp.broadcast_to(pooled[:, None, :], (1, a, e)).astype(o_ref.dtype)


def attentive_pool(x, w1, b1, w2, b2, *, t_tile=512):
    """x: (B, T, E); w1: (R, E); b1: (R,); w2: (A, R); b2: (A,) -> (B, A*E)."""
    B, T, E = x.shape
    R = w1.shape[0]
    A = w2.shape[0]

    # T tile: multiple of 8 sublanes, capped for the VMEM double-buffering budget.
    tt = min(t_tile, _round_up(T, 8))
    t_pad = _round_up(T, tt)
    if t_pad != T:
        x = jnp.pad(x, ((0, 0), (0, t_pad - T), (0, 0)))

    # Parameter layout prep (one-time glue): transpose fc1, take fc2 channel 0.
    w1t = jnp.asarray(w1).T.astype(x.dtype)                   # (E, R) native dtype for MXU
    b1_2d = jnp.asarray(b1).reshape(1, R).astype(jnp.float32)
    w2r = jnp.asarray(w2)[0].reshape(1, R).astype(jnp.float32)
    b2_2d = jnp.asarray(b2)[0].reshape(1, 1).astype(jnp.float32)

    grid = (B, t_pad // tt)
    kernel = functools.partial(
        _attentive_pool_kernel,
        t_actual=T,
        t_tile=tt,
        needs_mask=(t_pad != T),
    )

    out = pl.pallas_call(
        kernel,
        out_shape=jax.ShapeDtypeStruct((B, A, E), x.dtype),
        grid_spec=pltpu.PrefetchScalarGridSpec(
            num_scalar_prefetch=0,
            grid=grid,
            in_specs=[
                pl.BlockSpec((1, tt, E), lambda b, k: (b, k, 0)),
                # Constant index maps: weights fetched once, stay VMEM-resident.
                pl.BlockSpec((E, R), lambda b, k: (0, 0)),
                pl.BlockSpec((1, R), lambda b, k: (0, 0)),
                pl.BlockSpec((1, R), lambda b, k: (0, 0)),
                pl.BlockSpec((1, 1), lambda b, k: (0, 0)),
            ],
            # Output ignores the reduction axis k -> VMEM-resident target,
            # one HBM writeback per batch row.
            out_specs=pl.BlockSpec((1, A, E), lambda b, k: (b, 0, 0)),
            scratch_shapes=[
                pltpu.VMEM((1, 1), jnp.float32),   # running max
                pltpu.VMEM((1, 1), jnp.float32),   # running softmax denom
                pltpu.VMEM((1, E), jnp.float32),   # running weighted sum
            ],
        ),
        compiler_params=pltpu.CompilerParams(
            dimension_semantics=("parallel", "arbitrary"),
            vmem_limit_bytes=32 * 1024 * 1024,
        ),
    )(x, w1t, b1_2d, w2r, b2_2d)

    # (B, A, E) -> (B, A*E): contiguous reshape, free at the XLA level.
    return out.reshape(B, A * E)


def _attentive_pool_ref(x, w1, b1, w2, b2):
    # Pure-JAX reference mirroring the PyTorch forward (including the channel-0
    # reuse in the concat loop).
    x32 = x.astype(jnp.float32)
    h = jnp.tanh(
        jnp.einsum("bte,re->btr", x32, w1.astype(jnp.float32),
                   precision=lax.Precision.HIGHEST) + b1.astype(jnp.float32))
    logits = jnp.einsum("btr,ar->bta", h, w2.astype(jnp.float32),
                        precision=lax.Precision.HIGHEST) + b2.astype(jnp.float32)
    weights = jax.nn.softmax(logits, axis=1)
    w0 = weights[:, :, 0:1]                                  # (B, T, 1)
    pooled = (w0 * x32).mean(axis=1)                         # (B, E)
    out = pooled
    for _ in range(1, logits.shape[-1]):
        out = jnp.concatenate([out, (w0 * x32).mean(axis=1)], axis=-1)
    return out.astype(x.dtype)


if __name__ == "__main__":
    key = jax.random.PRNGKey(0)
    B, T, E = 2, 8, 32
    reduction, att_channel = 4, 2
    R = E // reduction

    kx, k1, k2, k3, k4 = jax.random.split(key, 5)
    x = jax.random.normal(kx, (B, T, E), dtype=jnp.float32)
    w1 = jax.random.normal(k1, (R, E), dtype=jnp.float32) * 0.1
    b1 = jax.random.normal(k2, (R,), dtype=jnp.float32) * 0.1
    w2 = jax.random.normal(k3, (att_channel, R), dtype=jnp.float32) * 0.1
    b2 = jax.random.normal(k4, (att_channel,), dtype=jnp.float32) * 0.1

    out = attentive_pool(x, w1, b1, w2, b2)
    out = jax.block_until_ready(out)

    ref = _attentive_pool_ref(x, w1, b1, w2, b2)
    assert out.shape == (B, att_channel * E), out.shape
    assert jnp.allclose(out, ref, atol=1e-4, rtol=1e-4), (
        "mismatch vs reference, max abs err = %e"
        % float(jnp.max(jnp.abs(out - ref))))

    print("KERNEL_OK")
</pallas_src>

<mosaic_0001>
module attributes {stable_mosaic.version = 11 : i64} {
  func.func @_attentive_pool_kernel(%arg0: i32, %arg1: i32, %arg2: memref<1x8x32xf32, #tpu.memory_space<vmem>>, %arg3: memref<32x8xf32, #tpu.memory_space<vmem>>, %arg4: memref<1x8xf32, #tpu.memory_space<vmem>>, %arg5: memref<1x8xf32, #tpu.memory_space<vmem>>, %arg6: memref<1x1xf32, #tpu.memory_space<vmem>>, %arg7: memref<1x2x32xf32, #tpu.memory_space<vmem>>, %arg8: memref<1x1xf32, #tpu.memory_space<vmem>>, %arg9: memref<1x1xf32, #tpu.memory_space<vmem>>, %arg10: memref<1x32xf32, #tpu.memory_space<vmem>>) attributes {dimension_semantics = [#tpu.dimension_semantics<parallel>, #tpu.dimension_semantics<arbitrary>], iteration_bounds = array<i64: 2, 1>, scalar_prefetch = 0 : i64, scratch_operands = 3 : i64, tpu.core_type = #tpu.core_type<tc>, window_params = [{transform_indices = @transform_0, window_bounds = array<i64: 1, 8, 32>}, {pipeline_mode = #tpu.pipeline_mode<synchronous>, transform_indices = @transform_1, window_bounds = array<i64: 32, 8>}, {pipeline_mode = #tpu.pipeline_mode<synchronous>, transform_indices = @transform_2, window_bounds = array<i64: 1, 8>}, {pipeline_mode = #tpu.pipeline_mode<synchronous>, transform_indices = @transform_3, window_bounds = array<i64: 1, 8>}, {pipeline_mode = #tpu.pipeline_mode<synchronous>, transform_indices = @transform_4, window_bounds = array<i64: 1, 1>}, {transform_indices = @transform_5, window_bounds = array<i64: 1, 2, 32>}]} {
    %c0_i32 = arith.constant 0 : i32
    %0 = arith.cmpi eq, %arg1, %c0_i32 : i32
    %1 = arith.extui %0 : i1 to i32
    %c0_i32_0 = arith.constant 0 : i32
    %2 = arith.cmpi ne, %1, %c0_i32_0 : i32
    scf.if %2 {
      %cst_29 = arith.constant 0xFF800000 : f32
      %47 = vector.broadcast %cst_29 : f32 to vector<1x1xf32>
      %c0_30 = arith.constant 0 : index
      %c0_31 = arith.constant 0 : index
      %48 = vector.load %arg8[%c0_30, %c0_31] : memref<1x1xf32, #tpu.memory_space<vmem>>, vector<1x1xf32>
      tpu.vector_store %arg8[%c0_30, %c0_31], %47 {strides = array<i32>} : memref<1x1xf32, #tpu.memory_space<vmem>>, vector<1x1xf32>,
      %cst_32 = arith.constant 0.000000e+00 : f32
      %49 = vector.broadcast %cst_32 : f32 to vector<1x1xf32>
      %c0_33 = arith.constant 0 : index
      %c0_34 = arith.constant 0 : index
      %50 = vector.load %arg9[%c0_33, %c0_34] : memref<1x1xf32, #tpu.memory_space<vmem>>, vector<1x1xf32>
      tpu.vector_store %arg9[%c0_33, %c0_34], %49 {strides = array<i32>} : memref<1x1xf32, #tpu.memory_space<vmem>>, vector<1x1xf32>,
      %cst_35 = arith.constant 0.000000e+00 : f32
      %51 = vector.broadcast %cst_35 : f32 to vector<1x32xf32>
      %c0_36 = arith.constant 0 : index
      %c0_37 = arith.constant 0 : index
      %52 = vector.load %arg10[%c0_36, %c0_37] : memref<1x32xf32, #tpu.memory_space<vmem>>, vector<1x32xf32>
      tpu.vector_store %arg10[%c0_36, %c0_37], %51 {strides = array<i32>} : memref<1x32xf32, #tpu.memory_space<vmem>>, vector<1x32xf32>,
    } else {
    }
    %c0 = arith.constant 0 : index
    %c0_1 = arith.constant 0 : index
    %c0_2 = arith.constant 0 : index
    %3 = vector.load %arg2[%c0, %c0_1, %c0_2] : memref<1x8x32xf32, #tpu.memory_space<vmem>>, vector<1x8x32xf32>
    %4 = vector.shape_cast %3 : vector<1x8x32xf32> to vector<8x32xf32>
    %c0_3 = arith.constant 0 : index
    %c0_4 = arith.constant 0 : index
    %5 = vector.load %arg3[%c0_3, %c0_4] : memref<32x8xf32, #tpu.memory_space<vmem>>, vector<32x8xf32>
    %cst = arith.constant dense<0.000000e+00> : vector<8x8xf32>
    %6 = tpu.matmul %4, %5, %cst {dimension_numbers = #tpu.dot_dimension_numbers<[1], [0], [0], [1], [0, 0, 1, 1], [], []>, precision = #tpu.contract_precision<fp32>} : vector<8x32xf32>, vector<32x8xf32>, vector<8x8xf32> -> vector<8x8xf32>
    %c0_5 = arith.constant 0 : index
    %c0_6 = arith.constant 0 : index
    %7 = vector.load %arg4[%c0_5, %c0_6] : memref<1x8xf32, #tpu.memory_space<vmem>>, vector<1x8xf32>
    %8 = vector.broadcast %7 : vector<1x8xf32> to vector<8x8xf32>
    %9 = arith.addf %6, %8 : vector<8x8xf32>
    %10 = math.tanh %9 : vector<8x8xf32>
    %c0_7 = arith.constant 0 : index
    %c0_8 = arith.constant 0 : index
    %11 = vector.load %arg5[%c0_7, %c0_8] : memref<1x8xf32, #tpu.memory_space<vmem>>, vector<1x8xf32>
    %12 = vector.broadcast %11 : vector<1x8xf32> to vector<8x8xf32>
    %13 = arith.mulf %10, %12 : vector<8x8xf32>
    %cst_9 = arith.constant dense<0.000000e+00> : vector<8xf32>
    %14 = vector.multi_reduction <add>, %13, %cst_9 [1] : vector<8x8xf32> to vector<8xf32>
    %15 = vector.shape_cast %14 : vector<8xf32> to vector<8x1xf32>
    %c0_10 = arith.constant 0 : index
    %c0_11 = arith.constant 0 : index
    %16 = vector.load %arg6[%c0_10, %c0_11] : memref<1x1xf32, #tpu.memory_space<vmem>>, vector<1x1xf32>
    %17 = vector.broadcast %16 : vector<1x1xf32> to vector<8x1xf32>
    %18 = arith.addf %15, %17 : vector<8x1xf32>
    %c0_12 = arith.constant 0 : index
    %c0_13 = arith.constant 0 : index
    %19 = vector.load %arg8[%c0_12, %c0_13] : memref<1x1xf32, #tpu.memory_space<vmem>>, vector<1x1xf32>
    %cst_14 = arith.constant dense<0xFF800000> : vector<1xf32>
    %20 = vector.multi_reduction <maximumf>, %18, %cst_14 [0] : vector<8x1xf32> to vector<1xf32>
    %21 = vector.shape_cast %20 : vector<1xf32> to vector<1x1xf32>
    %22 = arith.maximumf %19, %21 : vector<1x1xf32>
    %23 = arith.subf %19, %22 : vector<1x1xf32>
    %24 = math.exp %23 : vector<1x1xf32>
    %25 = vector.broadcast %22 : vector<1x1xf32> to vector<8x1xf32>
    %26 = arith.subf %18, %25 : vector<8x1xf32>
    %27 = math.exp %26 : vector<8x1xf32>
    %c0_15 = arith.constant 0 : index
    %c0_16 = arith.constant 0 : index
    %28 = vector.load %arg9[%c0_15, %c0_16] : memref<1x1xf32, #tpu.memory_space<vmem>>, vector<1x1xf32>
    %29 = arith.mulf %24, %28 : vector<1x1xf32>
    %cst_17 = arith.constant dense<0.000000e+00> : vector<1xf32>
    %30 = vector.multi_reduction <add>, %27, %cst_17 [0] : vector<8x1xf32> to vector<1xf32>
    %31 = vector.shape_cast %30 : vector<1xf32> to vector<1x1xf32>
    %32 = arith.addf %29, %31 : vector<1x1xf32>
    %c0_18 = arith.constant 0 : index
    %c0_19 = arith.constant 0 : index
    %33 = vector.load %arg9[%c0_18, %c0_19] : memref<1x1xf32, #tpu.memory_space<vmem>>, vector<1x1xf32>
    tpu.vector_store %arg9[%c0_18, %c0_19], %32 {strides = array<i32>} : memref<1x1xf32, #tpu.memory_space<vmem>>, vector<1x1xf32>,
    %c0_20 = arith.constant 0 : index
    %c0_21 = arith.constant 0 : index
    %34 = vector.load %arg10[%c0_20, %c0_21] : memref<1x32xf32, #tpu.memory_space<vmem>>, vector<1x32xf32>
    %35 = vector.broadcast %24 : vector<1x1xf32> to vector<1x32xf32>
    %36 = arith.mulf %35, %34 : vector<1x32xf32>
    %37 = vector.broadcast %27 : vector<8x1xf32> to vector<8x32xf32>
    %38 = arith.mulf %37, %4 : vector<8x32xf32>
    %cst_22 = arith.constant dense<0.000000e+00> : vector<32xf32>
    %39 = vector.multi_reduction <add>, %38, %cst_22 [0] : vector<8x32xf32> to vector<32xf32>
    %40 = vector.shape_cast %39 : vector<32xf32> to vector<1x32xf32>
    %41 = arith.addf %36, %40 : vector<1x32xf32>
    %c0_23 = arith.constant 0 : index
    %c0_24 = arith.constant 0 : index
    %42 = vector.load %arg10[%c0_23, %c0_24] : memref<1x32xf32, #tpu.memory_space<vmem>>, vector<1x32xf32>
    tpu.vector_store %arg10[%c0_23, %c0_24], %41 {strides = array<i32>} : memref<1x32xf32, #tpu.memory_space<vmem>>, vector<1x32xf32>,
    %c0_25 = arith.constant 0 : index
    %c0_26 = arith.constant 0 : index
    %43 = vector.load %arg8[%c0_25, %c0_26] : memref<1x1xf32, #tpu.memory_space<vmem>>, vector<1x1xf32>
    tpu.vector_store %arg8[%c0_25, %c0_26], %22 {strides = array<i32>} : memref<1x1xf32, #tpu.memory_space<vmem>>, vector<1x1xf32>,
    %c0_i32_27 = arith.constant 0 : i32
    %44 = arith.cmpi eq, %arg1, %c0_i32_27 : i32
    %45 = arith.extui %44 : i1 to i32
    %c0_i32_28 = arith.constant 0 : i32
    %46 = arith.cmpi ne, %45, %c0_i32_28 : i32
    scf.if %46 {
      %c0_29 = arith.constant 0 : index
      %c0_30 = arith.constant 0 : index
      %47 = vector.load %arg9[%c0_29, %c0_30] : memref<1x1xf32, #tpu.memory_space<vmem>>, vector<1x1xf32>
      %48 = tpu.reciprocal %47 : vector<1x1xf32> -> vector<1x1xf32>
      %c0_31 = arith.constant 0 : index
      %c0_32 = arith.constant 0 : index
      %49 = vector.load %arg10[%c0_31, %c0_32] : memref<1x32xf32, #tpu.memory_space<vmem>>, vector<1x32xf32>
      %50 = vector.broadcast %48 : vector<1x1xf32> to vector<1x32xf32>
      %51 = arith.mulf %49, %50 : vector<1x32xf32>
      %cst_33 = arith.constant 1.250000e-01 : f32
      %52 = vector.broadcast %cst_33 : f32 to vector<1x32xf32>
      %53 = arith.mulf %51, %52 : vector<1x32xf32>
      %54 = vector.shape_cast %53 : vector<1x32xf32> to vector<1x1x32xf32>
      %55 = vector.shape_cast %54 : vector<1x1x32xf32> to vector<1x1x32xf32>
      %56 = vector.broadcast %55 : vector<1x1x32xf32> to vector<1x2x32xf32>
      %c0_34 = arith.constant 0 : index
      %c0_35 = arith.constant 0 : index
      %c0_36 = arith.constant 0 : index
      %57 = vector.load %arg7[%c0_34, %c0_35, %c0_36] : memref<1x2x32xf32, #tpu.memory_space<vmem>>, vector<1x2x32xf32>
      tpu.vector_store %arg7[%c0_34, %c0_35, %c0_36], %56 {strides = array<i32>} : memref<1x2x32xf32, #tpu.memory_space<vmem>>, vector<1x2x32xf32>,
    } else {
    }
    return
  }
  func.func @transform_0(%arg0: i32, %arg1: i32) -> (i32, i32, i32) {
    %c0_i32 = arith.constant 0 : i32
    %c0_i32_0 = arith.constant 0 : i32
    return %arg0, %arg1, %c0_i32 : i32, i32, i32
  }
  func.func @transform_1(%arg0: i32, %arg1: i32) -> (i32, i32) {
    %c0_i32 = arith.constant 0 : i32
    %c0_i32_0 = arith.constant 0 : i32
    %c0_i32_1 = arith.constant 0 : i32
    return %c0_i32, %c0_i32_0 : i32, i32
  }
  func.func @transform_2(%arg0: i32, %arg1: i32) -> (i32, i32) {
    %c0_i32 = arith.constant 0 : i32
    %c0_i32_0 = arith.constant 0 : i32
    %c0_i32_1 = arith.constant 0 : i32
    return %c0_i32, %c0_i32_0 : i32, i32
  }
  func.func @transform_3(%arg0: i32, %arg1: i32) -> (i32, i32) {
    %c0_i32 = arith.constant 0 : i32
    %c0_i32_0 = arith.constant 0 : i32
    %c0_i32_1 = arith.constant 0 : i32
    return %c0_i32, %c0_i32_0 : i32, i32
  }
  func.func @transform_4(%arg0: i32, %arg1: i32) -> (i32, i32) {
    %c0_i32 = arith.constant 0 : i32
    %c0_i32_0 = arith.constant 0 : i32
    %c0_i32_1 = arith.constant 0 : i32
    return %c0_i32, %c0_i32_0 : i32, i32
  }
  func.func @transform_5(%arg0: i32, %arg1: i32) -> (i32, i32, i32) {
    %c0_i32 = arith.constant 0 : i32
    %c0_i32_0 = arith.constant 0 : i32
    %c0_i32_1 = arith.constant 0 : i32
    return %arg0, %c0_i32, %c0_i32_0 : i32, i32, i32
  }
}

</mosaic_0001>

<bundles_post_ra>
// kernel: tpu_custom_call.1
= control target key start
LH: loop header
LB: loop body
LE: loop exit
PB: predicated region body
PF: predicated region fallthrough
CT: control target
= control target key end

     0   :  { %s1462_s0 = inlined_call_operand.vmem [shape: f32[2,8,32], index: 0, kind: input, shape index: {}]   ;;  %s1463_s1 = inlined_call_operand.vmem [shape: f32[32,8], index: 1, kind: input, shape index: {}]   ;;  %s1464_s2 = inlined_call_operand.vmem [shape: f32[1,8], index: 2, kind: input, shape index: {}]   ;;  %s1465_s3 = inlined_call_operand.vmem [shape: f32[1,8], index: 3, kind: input, shape index: {}]   ;;  %s1466_s4 = inlined_call_operand.<no memory space> [shape: f32[1,1], index: 4, kind: input, shape index: {}]   ;;  %s1467_s5 = inlined_call_operand.hbm [shape: f32[2,2,32], index: 5, kind: output, shape index: {}]  }
   0x1   :  { %v10_v0 = vstv %s1466_s4 }
   0x2   :  { %11 = vst [vmem:[#allocation5] sm:$0x1] %v10_v0 }
   0x3   :  { %12 = vsyncpa [#allocation7], 0 }
   0x4   :  { %14 = vsyncpa [#allocation7 + $0x1], 0  ;;  %s1292_s20 = smov 0   ;;  %s1294_s21 = smov 0  }
   0x5   :  { %s1296_s22 = smov 0   ;;  %s1298_s23 = smov 0  }
   0x6   :  { %s1300_s24 = smov 0   ;;  %s1302_s25 = smov 0  }
   0x7 LB: > { %s947_s4 = sadd.s32 4294967295, %s1251_s25   ;;  %s948_s26 = sadd.s32 4294967294, %s1251_s25   ;;  %s1251_s25 = sphi %s1302_s25, %s20_s25   ;;  %s1247_s24 = sphi %s1300_s24, %s1474_s24   ;;  %s1243_s23 = sphi %s1298_s23, %s1473_s23   ;;  %s1239_s22 = sphi %s1296_s22, %s1472_s22   ;;  %s1235_s21 = sphi %s1294_s21, %s1471_s21   ;;  %s1231_s20 = sphi %s1292_s20, %s1470_s20  }
   0x8   : > { %s32_s27 = sadd.s32 1, %s1247_s24  ;;  %s151_s28 = sadd.s32 1, %s1239_s22 }
   0x9   : > { %p34_p0 = scmp.ge.s32.totalorder %s32_s27, 2  ;;  %p161_p1 = scmp.ne.s32.totalorder %s1239_s22, %s1235_s21 }
   0xa   : > { %p162_p2 = scmp.eq.s32.totalorder %s947_s4, 1  ;;  %p167_p3 = scmp.ne.s32.totalorder %s1235_s21, %s1231_s20 }
   0xb   : > { %s1476_s27 = smov (%p34_p0, %s32_s27), 0  ;;  %p168_p5 = scmp.eq.s32.totalorder %s948_s26, 1 }
   0xc   : > { %p1332_p4 = por %p162_p2, %p161_p1  ;;  %s148_s30 = ssub.s32 %s1247_s24, %s1476_s27 }
   0xd   : > { %p951_p6 = scmp.ge.s32.totalorder %s1251_s25, 1  ;;  %p149_p7 = scmp.eq.s32.totalorder %s148_s30, 0 }
   0xe   : > { %p1339_p8 = por %p168_p5, %p167_p3  ;;  %p208_p9 = scmp.lt.s32.totalorder %s1251_s25, 3 }
   0xf   : > { %s1345_s7 = scalar_select %p149_p7, %s1239_s22, %s151_s28  }
  0x10   : > { %p209_p10 = pnand %p951_p6, %p208_p9 }
  0x11   : > { %v255_v1 = vld [vmem:[%s1463_s1] sm:$0xff] (!%p209_p10)  ;;  %v256_v2 = vld [vmem:[%s1463_s1 + $0x8] sm:$0xff] (!%p209_p10)  ;;  %v257_v3 = vld [vmem:[%s1463_s1 + $0x10] sm:$0xff] (!%p209_p10)  ;;  %vm252_vm0 = vcmask (!%p209_p10), 253952   ;;  %v1253_v4 = vmov (!%p209_p10), 0.0|0.0   ;;  %v1254_v9 = vmov (!%p209_p10), 0.0   ;;  %v790_v60 = vlaneseq (!%p209_p10) }
  0x12   : > { %212 = sbr.rel (%p209_p10) target bundleno = 647 (0x287), region = 40  ;;  %1075 = vmatprep.subr.bf16.mxu0 (!%p209_p10), %v1253_v4  ;;  %v271_v5 = vand.u32 (!%p209_p10), 4294901760, %v255_v1  ;;  %v274_v6 = vand.u32 (!%p209_p10), 4294901760, %v256_v2  ;;  %1057 = vmatprep.subr.bf16.mxu1 (!%p209_p10), %v1253_v4  ;;  %v258_v7 = vld [vmem:[%s1463_s1 + $0x18] sm:$0xff] (!%p209_p10)  ;;  %v277_v8 = vand.u32 (!%p209_p10), 4294901760, %v257_v3  ;;  %p238_p11 = scmp.lt.s32.totalorder (!%p209_p10), %s1243_s23, 1 }
  0x13   : > { %253 = vst.msk [vmem:[#allocation4] sm:$0x1] (!%p209_p10), %vm252_vm0, %v1254_v9  ;;  %v280_v10 = vand.u32 (!%p209_p10), 4294901760, %v258_v7  ;;  %vm1255_vm1 = vmmov (!%p209_p10), 0   ;;  %vm266_vm2 = vcmask (!%p209_p10), 261120   ;;  %vm249_vm3 = vcmask (!%p209_p10), 0  }
  0x14   : > { %1032 = vmatprep.mubr.msk.f32.mxu0 (!%p209_p10), %vm1255_vm1, %v1254_v9  ;;  %999 = vmatprep.mubr.msk.f32.mxu1 (!%p209_p10), %vm1255_vm1, %v1254_v9  ;;  %v1058_v11 = vpack.c.bf16 (!%p209_p10), %v274_v6, %v271_v5  ;;  %v351_v12 = vsub.f32 (!%p209_p10), %v255_v1, %v271_v5  ;;  %v358_v13 = vsub.f32 (!%p209_p10), %v256_v2, %v274_v6  ;;  %v1256_v42 = vmov (!%p209_p10), -inf   ;;  %v954_v45 = vld [vmem:[%s1464_s2] ss:$0 sm:$0xff] (!%p209_p10)  ;;  %v956_v55 = vld [vmem:[#allocation5] ss:$0 sm:$0xff] (!%p209_p10)  ;;  %s235_s9 = sand.u32 (!%p209_p10), 1, %s1235_s21  }
  0x15   : > { %v365_v14 = vsub.f32 (!%p209_p10), %v257_v3, %v277_v8  ;;  %v372_v15 = vsub.f32 (!%p209_p10), %v258_v7, %v280_v10  ;;  %v1061_v16 = vpack.c.bf16 (!%p209_p10), %v280_v10, %v277_v8  ;;  %250 = vst.msk [vmem:[#allocation2] sm:$0x1] (!%p209_p10), %vm249_vm3, %v1256_v42  ;;  %251 = vst.msk [vmem:[#allocation3] sm:$0x1] (!%p209_p10), %vm249_vm3, %v1254_v9  ;;  %v955_v50 = vld [vmem:[%s1465_s3] ss:$0 sm:$0xff] (!%p209_p10) }
  0x16   : > { %1077 = vmatpush3.bf16.msra.mxu0 (!%p209_p10), %v1058_v11  ;;  %1059 = vmatpush3.bf16.msra.mxu1 (!%p209_p10), %v1058_v11  ;;  %v352_v17 = vand.u32 (!%p209_p10), 4294901760, %v351_v12  ;;  %v359_v18 = vand.u32 (!%p209_p10), 4294901760, %v358_v13  ;;  %v1070_v40 = vpack.c.bf16 (!%p209_p10), %v358_v13, %v351_v12  ;;  %vm764_vm4 = vcmask (!%p209_p10), 64512   ;;  %s952_s10 = sshll.u32 (!%p209_p10), %s235_s9, 1  ;;  %s958_s11 = sshll.u32 (!%p209_p10), %s1243_s23, 5 }
  0x17   : > { %1078 = vmatprep.subr.bf16.mxu0 (!%p209_p10), %v1253_v4  ;;  %1060 = vmatprep.subr.bf16.mxu1 (!%p209_p10), %v1253_v4  ;;  %v366_v20 = vand.u32 (!%p209_p10), 4294901760, %v365_v14  ;;  %v373_v24 = vand.u32 (!%p209_p10), 4294901760, %v372_v15  ;;  %v1073_v41 = vpack.c.bf16 (!%p209_p10), %v372_v15, %v365_v14  ;;  %v1257_v54 = vmov (!%p209_p10), 0   ;;  %s237_s12 = scalar_lea.vmem (!%p209_p10), [#allocation6], %s952_s10 }
  0x18   : > { %v353_v22 = vsub.f32 (!%p209_p10), %v351_v12, %v352_v17  ;;  %v360_v23 = vsub.f32 (!%p209_p10), %v358_v13, %v359_v18  ;;  %v1082_v27 = vpack.c.bf16 (!%p209_p10), %v359_v18, %v352_v17  ;;  %1164 = vset.pattern.permute.xlu1 (!%p209_p10), %v1257_v54  ;;  %1163 = vset.pattern.permute.xlu0 (!%p209_p10), %v1257_v54  ;;  %vm777_vm5 = vcmask (!%p209_p10), 7168   ;;  %s877_s13 = sshll.u32 (!%p209_p10), %s237_s12, 4  ;;  %s1417_s13 = int_to_ptr.vmem [resolvable:$true] %s877_s13 }
  0x19   : > { %s239_s16 = scalar_select %p238_p11, %s1243_s23, 1  ;;  %v367_v30 = vsub.f32 %v365_v14, %v366_v20  ;;  %v374_v31 = vsub.f32 %v372_v15, %v373_v24  ;;  %v1085_v35 = vpack.c.bf16 %v373_v24, %v366_v20  ;;  %v791_v63 = vshrl.u32 %v790_v60, 7 }
  0x1a   : > { %1080 = vmatpush3.bf16.msra.mxu0 %v1061_v16  ;;  %1062 = vmatpush3.bf16.msra.mxu1 %v1061_v16  ;;  %v354_v28 = vand.u32 4294901760, %v353_v22  ;;  %v361_v29 = vand.u32 4294901760, %v360_v23  ;;  %vm861_vm6 = vcmask 254976   ;;  %s1173_s18 = scalar_lea.vmem %s1417_s13, 32  ;;  %s1258_s23 = smov [#allocation6]  }
  0x1b   : > { %s953_s17 = sshll.u32 %s239_s16, 3  ;;  %1081 = vmatprep.subr.bf16.mxu0 %v1253_v4  ;;  %1063 = vmatprep.subr.bf16.mxu1 %v1253_v4  ;;  %v368_v36 = vand.u32 4294901760, %v367_v30  ;;  %v375_v37 = vand.u32 4294901760, %v374_v31  ;;  %v792_v3 = vsub.s32 0, %v791_v63  ;;  %s1415_s16 = scalar_lea.hbm %s1467_s5, %s958_s11 }
  0x1c   : > { %s244_s4 = scalar_lea.vmem %s1462_s0, %s953_s17  ;;  %v1064_v34 = vpack.c.bf16 %v361_v29, %v354_v28  ;;  %v776_v2 = vld [vmem:[#allocation2] sm:$0x1]  ;;  %v798_v18 = vld [vmem:[#allocation3] sm:$0x1]  ;;  %s864_s17 = scalar_lea.sflag [#allocation7], %s235_s9 }
  0x1d   : > { %v1374_v19 = vld [vmem:[%s244_s4] sm:$0xff]  ;;  %v1067_v39 = vpack.c.bf16 %v375_v37, %v368_v36  ;;  %p1174_p12 = scmp.ne.s32.totalorder %s1417_s13, %s1173_s18  ;;  %s1177_s19 = sshll.u32 %s1258_s23, 4  ;;  %s1178_s19 = int_to_ptr.vmem [resolvable:$false] %s1177_s19 }
  0x1e   : > { %v268_v21 = vsel %vm266_vm2, %v1374_v19, 0  ;;  %s1179_s4 = scalar_lea.vmem %s1178_s19, 64  ;;  %p1180_p1 = scmp.lt.s32.totalorder %s1417_s13, %s1178_s19 }
  0x1f   : > { %v339_v25 = vand.u32 4294901760, %v268_v21  ;;  %p1175_p13 = pnand %p1174_p12, %p1332_p4  ;;  %p1181_p2 = scmp.lt.s32.totalorder %s1179_s4, %s1173_s18 }
  0x21   : > { %v340_v26 = vsub.f32 %v268_v21, %v339_v25  ;;  %p1176_p0 = pneg %p1175_p13  ;;  %p1182_p3 = por %p1181_p2, %p1180_p1 }
  0x23   : > { %v341_v32 = vand.u32 4294901760, %v340_v26  ;;  %p1183_p5 = pnand %p1182_p3, %p1176_p0 }
  0x25   : > { %1033 = vmatmul.mubr.f32.vlgmr.msra.gmra.mrb[0].mxu0 %v341_v32  ;;  %v342_v33 = vsub.f32 %v340_v26, %v341_v32 }
  0x26   : > { %1083 = vmatpush3.bf16.msra.mxu0 %v1082_v27  ;;  %1043 = vmatprep.mubr.msk.f32.mxu0 %vm1255_vm1, %v1254_v9 }
  0x27   : > { %v343_v38 = vand.u32 4294901760, %v342_v33  ;;  %1084 = vmatprep.subr.bf16.mxu0 %v1253_v4 }
  0x29   : > { %1000 = vmatmul.mubr.f32.vlgmr.msra.gmra.mrb[0].mxu1 %v343_v38 }
  0x2a   : > { %1065 = vmatpush3.bf16.msra.mxu1 %v1064_v34  ;;  %1086 = vmatpush3.bf16.msra.mxu0 %v1085_v35  ;;  %v810_v35 = vld [vmem:[#allocation4] sm:$0x1] }
  0x2b   : > { %1066 = vmatprep.subr.bf16.mxu1 %v1253_v4  ;;  %1087 = vmatprep.subr.bf16.mxu0 %v1253_v4 }
  0x2c   : > { %1010 = vmatprep.mubr.msk.f32.mxu1 %vm1255_vm1, %v1254_v9 }
  0x2d   : > { %1044 = vmatmul.mubr.f32.vlgmr.msra.gmra.mrb[0].mxu0 %v339_v25 }
  0x2e   : > { %1068 = vmatpush3.bf16.msra.mxu1 %v1067_v39  ;;  %1089 = vmatpush3.bf16.msra.mxu0 %v1058_v11 }
  0x2f   : > { %1069 = vmatprep.subr.bf16.mxu1 %v1253_v4  ;;  %1090 = vmatprep.subr.bf16.mxu0 %v1253_v4 }
  0x30   : > { %1054 = vmatprep.mubr.msk.f32.mxu0 %vm1255_vm1, %v1254_v9 }
  0x31   : > { %1011 = vmatmul.mubr.f32.vlgmr.msra.gmra.mrb[0].mxu1 %v339_v25 }
  0x32   : > { %1071 = vmatpush3.bf16.msra.mxu1 %v1070_v40  ;;  %1092 = vmatpush3.bf16.msra.mxu0 %v1061_v16 }
  0x33   : > { %1072 = vmatprep.subr.bf16.mxu1 %v1253_v4  ;;  %1021 = vmatprep.mubr.msk.f32.mxu1 %vm1255_vm1, %v1254_v9 }
  0x35   : > { %1055 = vmatmul.mubr.f32.vlgmr.msra.gmra.mrb[0].mxu0 %v339_v25 }
  0x36   : > { %1074 = vmatpush3.bf16.msra.mxu1 %v1073_v41 }
  0x39   : > { %1022 = vmatmul.mubr.f32.vlgmr.msra.gmra.mrb[0].mxu1 %v340_v26 }
 0x108   : > { %v751_v43 = vpop.f32.mrb[0].mxu0 }
 0x109   : > { %v1056_v44 = vpop.f32.mrb[1].mxu0 }
 0x10c   : > { %v516_v46 = vpop.f32.mrb[0].mxu1 }
 0x10d   : > { %v1093_v47 = vadd.f32 %v954_v45, %v516_v46  ;;  %v1023_v48 = vpop.f32.mrb[1].mxu1 }
 0x10f   : > { %v1094_v49 = vadd.f32 %v1093_v47, %v751_v43 }
 0x111   : > { %1165 = vtanh.f32 %v1094_v49 }
 0x11b   : > { %v1166_v51 = vpop.eup %1165 }
 0x11c   : > { %v763_v52 = vmul.f32 %v1166_v51, %v955_v50 }
 0x11e   : > { %v765_v53 = vsel %vm764_vm4, %v763_v52, 0.0 }
 0x11f   : > { %766 = vadd.xlane.f32.xlu0 %v765_v53 }
 0x1ac   : > { %v767_v56 = vpop.xlane.xlu0 %766 }
 0x1ad   : > { %v775_v57 = vadd.f32 %v956_v55, %v767_v56 }
 0x1af   : > { %v778_v58 = vsel %vm777_vm5, %v775_v57, -inf }
 0x1b0   : > { %v779_v59 = vrot.slane %v778_v58, 4 }
 0x1b2   : > { %v780_v61 = vmax.f32 %v778_v58, %v779_v59 }
 0x1b4   : > { %v781_v62 = vrot.slane %v780_v61, 2 }
 0x1b6   : > { %v782_v0 = vmax.f32 %v780_v61, %v781_v62 }
 0x1b8   : > { %v783_v1 = vrot.slane %v782_v0, 1 }
 0x1ba   : > { %v784_v4 = vmax.f32 %v782_v0, %v783_v1 }
 0x1bc   : > { %v785_v5 = vmax.f32 %v776_v2, %v784_v4 }
 0x1be   : > { %v793_v6 = vrot.slane %v785_v5, %v792_v3  ;;  %837 = vst.msk [vmem:[#allocation2] sm:$0x1] %vm249_vm3, %v785_v5  ;;  %v786_v7 = vsub.f32 %v776_v2, %v785_v5 }
 0x1c0   : > { %v795_v8 = vsub.f32 %v775_v57, %v793_v6  ;;  %v787_v9 = vmul.f32 1.442695, %v786_v7 }
 0x1c2   : > { %v796_v10 = vmul.f32 1.442695, %v795_v8  ;;  %1167 = vpow2.f32 %v787_v9 }
 0x1c4   : > { %1169 = vpow2.f32 %v796_v10 }
 0x1cc   : > { %v1168_v11 = vpop.eup %1167 }
 0x1cd   : > { %813 = vperm.xlu1 %1164, %v1168_v11   ;;  %v799_v22 = vmul.f32 %v1168_v11, %v798_v18 }
 0x1ce   : > { %v1170_v12 = vpop.eup %1169 }
 0x1cf   : > { %v800_v13 = vsel %vm777_vm5, %v1170_v12, 0.0  ;;  %823 = vperm.xlu0 %1163, %v1170_v12  }
 0x1d0   : > { %v801_v14 = vrot.slane %v800_v13, 4 }
 0x1d2   : > { %v802_v15 = vadd.f32 %v801_v14, %v800_v13 }
 0x1d4   : > { %v803_v16 = vrot.slane %v802_v15, 2 }
 0x1d6   : > { %v804_v17 = vadd.f32 %v803_v16, %v802_v15 }
 0x1d8   : > { %v805_v20 = vrot.slane %v804_v17, 1 }
 0x1da   : > { %v806_v21 = vadd.f32 %v805_v20, %v804_v17 }
 0x1dc   : > { %v807_v23 = vadd.f32 %v806_v21, %v799_v22 }
 0x1de   : > { %809 = vst.msk [vmem:[#allocation3] sm:$0x1] %vm249_vm3, %v807_v23 }
 0x1e5   : > { %v841_v24 = vld [vmem:[#allocation3] sm:$0x1] }
 0x1e6   : > { %1171 = vrcp.f32 %v841_v24 }
 0x1f0   : > { %v1172_v25 = vpop.eup %1171 }
 0x1f1   : > { %846 = vperm.xlu1 %1164, %v1172_v25  }
 0x24c   : > { %v814_v31 = vpop.permute.xlu1 %813 }
 0x24d   : > { %v819_v33 = vrot.slane %v814_v31, %v792_v3 }
 0x24e   : > { %v824_v26 = vpop.permute.xlu0 %823 }
 0x24f   : > { %v826_v27 = vmul.f32 %v824_v26, %v1374_v19  ;;  %v820_v37 = vmul.f32 %v819_v33, %v810_v35 }
 0x251   : > { %v827_v28 = vsel %vm266_vm2, %v826_v27, 0.0 }
 0x252   : > { %v828_v29 = vrot.slane %v827_v28, 4 }
 0x254   : > { %v829_v30 = vadd.f32 %v828_v29, %v827_v28 }
 0x256   : > { %v830_v32 = vrot.slane %v829_v30, 2 }
 0x258   : > { %v831_v34 = vadd.f32 %v830_v32, %v829_v30 }
 0x25a   : > { %v832_v36 = vrot.slane %v831_v34, 1 }
 0x25c   : > { %v833_v38 = vadd.f32 %v832_v36, %v831_v34 }
 0x25e   : > { %v834_v39 = vadd.f32 %v833_v38, %v820_v37 }
 0x260   : > { %836 = vst.msk [vmem:[#allocation4] sm:$0x1] %vm252_vm0, %v834_v39 }
 0x267   : > { %v843_v41 = vld [vmem:[#allocation4] sm:$0x1] }
 0x270   : > { %v847_v40 = vpop.permute.xlu1 %846 }
 0x271   : > { %v852_v19 = vrot.slane %v847_v40, %v792_v3 }
 0x273   : > { %v853_v42 = vmul.f32 %v852_v19, %v843_v41 }
 0x275   : > { %v854_v43 = vmul.f32 0.125, %v853_v42 }
 0x277   : > { %v859_v44 = vrot.slane %v854_v43, %v792_v3 }
 0x279   : > { %862 = vst.msk [vmem:[%s237_s12] sm:$0x3] %vm861_vm6, %v859_v44 }
 0x27a   : > { %1186 = shalt.err (!%p1183_p5)
}
 0x27b   : > { %s1187_s26 = scalar_lea.hbm %s1415_s16, 32  ;;  %s1191_s8 = scalar_lea.hbm %s1467_s5, 64 }
 0x27c   : > { %p1188_p6 = scmp.ne.s32.totalorder %s1415_s16, %s1187_s26  ;;  %p1192_p10 = scmp.lt.u32.totalorder %s1415_s16, %s1467_s5 }
 0x27d   : > { %p1193_p11 = scmp.lt.u32.totalorder %s1191_s8, %s1187_s26  ;;  %p1195_p13 = scmp.lt.u32.totalorder %s1187_s26, %s1415_s16 }
 0x27e   : > { %p1189_p7 = pnand %p1188_p6, %p1332_p4 }
 0x27f   : > { %p1194_p12 = por %p1193_p11, %p1192_p10 }
 0x280   : > { %p1190_p9 = pneg %p1189_p7 }
 0x281   : > { %p1196_p0 = por %p1195_p13, %p1194_p12 }
 0x283   : > { %p1197_p1 = pnand %p1196_p0, %p1190_p9 }
 0x285   : > { %1200 = shalt.err (!%p1197_p1)
}
 0x286   : > { %1103 = dma.vmem_to_hbm [thread:$0]  (%p1332_p4), %s1417_s13, 32, %s1415_s16, %s864_s17  }
 0x287 PF: > { %p1109_p2 = scmp.ge.s32.totalorder %s1251_s25, 2  ;;  %s889_s11 = sand.u32 1, %s1231_s20  }
 0x288   : > { %s890_s12 = scalar_lea.sflag [#allocation7], %s889_s11 }
 0x289   : > { %p1106_p3 = pnand %p1109_p2, %p1339_p8 }
 0x28b   : > { %1226 = dma.done.wait (!%p1106_p3), %s890_s12, 32  }
 0x28c   : > { %1228 = vsyncadd (!%p1106_p3), %s890_s12, 4294967264  ;;  %s20_s25 = sadd.s32 1, %s1251_s25   ;;  %s1470_s20 = smov %s1235_s21 }
 0x28d   : > { %p17_p5 = scmp.ge.s32.totalorder %s20_s25, 4   ;;  %s1471_s21 = smov %s1239_s22 }
 0x28e   : > { %s1472_s22 = smov %s1345_s7  ;;  %s1473_s23 = smov %s1247_s24 }
 0x28f   : > { %s1474_s24 = smov %s1476_s27  ;;  %19 = sbr.rel (!%p17_p5) target bundleno = 7 (0x7), region = 83 }
 0x296   :  { %895 = vsyncpa [#allocation7], 1 }
 0x297   :  { %897 = vsyncpa [#allocation7 + $0x1], 1 }

</bundles_post_ra>
